<compile_context>
chip_gen: v7x
topology: tpu7x:2x2x1
jax: 0.10.0
libtpu: 0.0.40
codegen_flags: <defaults>
</compile_context>

<pallas_src>
import functools

import jax
import jax.numpy as jnp
import numpy as np
from jax.experimental import pallas as pl
from jax.experimental.pallas import tpu as pltpu

BN_EPS = 1e-5
_LANE = 128
_MIB = 2 ** 20
_X_STREAM_BYTES = 12 * _MIB       # budget for the double-buffered x-quadrant stream
_MAX_IMGS_PER_STEP = 8


def _cdiv(a, b):
    return (a + b - 1) // b


# ---------------------------------------------------------------------------
# Kernel 1: per-channel sum / sum-of-squares (BatchNorm batch statistics).
# x block: (n_blk, 4, Cin, hw_t).  Accumulates raw (Cin, hw_t) partial sums
# (per lane slot); the final lane reduction happens on the tiny result in the
# wrapper.  Grid (2, t_per_core, num_hw): axis 0 splits the batch tiles over
# two TensorCores; axes 1/2 are sequential accumulation axes.
# ---------------------------------------------------------------------------
def bn_stats_kernel(x_ref, sum_ref, sq_ref, *, n_blk, t_per_core, num_n):
    t = pl.program_id(1)
    h = pl.program_id(2)

    @pl.when((t == 0) & (h == 0))
    def _init():
        sum_ref[...] = jnp.zeros_like(sum_ref)
        sq_ref[...] = jnp.zeros_like(sq_ref)

    # Guard the (possibly) out-of-range last step of the second core split.
    is_valid = pl.program_id(0) * t_per_core + t < num_n

    @pl.when(is_valid)
    def _accumulate():
        s = None
        q = None
        for i in range(n_blk):
            for qd in range(4):
                xi = x_ref[i, qd].astype(jnp.float32)      # (Cin, hw_t)
                s = xi if s is None else s + xi
                q = xi * xi if q is None else q + xi * xi
        sum_ref[...] += s
        sq_ref[...] += q


# ---------------------------------------------------------------------------
# Kernel 2: per-tile  x*a+b -> ReLU -> 2x2 avg-pool (3 VPU adds) -> 1x1 conv
# (MXU, bf16 inputs / f32 accumulation by default).  0.25 is folded into w.
# Output block (n_blk, Cout, hw_t) is already channel-major per image (NCHW).
# ---------------------------------------------------------------------------
def transition_main_kernel(x_ref, scale_ref, bias_ref, w_ref, o_ref, *,
                           n_blk, conv_in_dtype):
    scale = scale_ref[...]            # (Cin, 1) f32, broadcasts along lanes
    bias = bias_ref[...]              # (Cin, 1) f32
    w = w_ref[...]                    # (Cout, Cin), 0.25 pre-folded, conv_in_dtype
    for i in range(n_blk):
        pooled = None
        for qd in range(4):
            y = jnp.maximum(x_ref[i, qd].astype(jnp.float32) * scale + bias, 0.0)
            pooled = y if pooled is None else pooled + y
        out = jnp.dot(w, pooled.astype(conv_in_dtype),
                      preferred_element_type=jnp.float32)   # (Cout, hw_t)
        o_ref[i] = out.astype(o_ref.dtype)


@functools.partial(jax.jit, static_argnames=("conv_in_dtype", "stage_dtype"))
def transition_forward(x_nchw, gamma, beta, conv_w, *,
                       conv_in_dtype=jnp.bfloat16, stage_dtype=jnp.float32):
    """x_nchw: (N, Cin, H, W); conv_w: (Cout, Cin, 1, 1) -> (N, Cout, H//2, W//2)."""
    N, Cin, H, W = x_nchw.shape
    Cout = conv_w.shape[0]
    assert H % 2 == 0 and W % 2 == 0, "AvgPool2d(2) fast path assumes even H, W"
    # TODO(synk): odd H/W needs ragged last row/col handling.
    Ho, Wo = H // 2, W // 2
    HW = Ho * Wo

    stage_item = jnp.dtype(stage_dtype).itemsize
    conv_item = jnp.dtype(conv_in_dtype).itemsize

    # ---- spatial tiling (only kicks in for large feature maps) --------------
    hw_t = HW
    while (2 * 4 * Cin * hw_t * stage_item > _X_STREAM_BYTES
           and hw_t % (2 * _LANE) == 0):
        hw_t //= 2
    num_hw = HW // hw_t

    # ---- balanced batch tiling (pad < one image block) ----------------------
    per_img_x = 4 * Cin * hw_t * stage_item
    n_blk = max(1, min(_MAX_IMGS_PER_STEP,
                       _X_STREAM_BYTES // max(1, 2 * per_img_x), N))
    num_n = _cdiv(N, n_blk)
    n_blk = _cdiv(N, num_n)
    num_n = _cdiv(N, n_blk)
    Npad = n_blk * num_n
    t_per_core = _cdiv(num_n, 2)      # stats pass: batch tiles split over 2 TCs

    # ---- stage the four 2x2-window quadrants, un-inflated, channel-major ----
    xq = x_nchw.astype(stage_dtype).reshape(N, Cin, Ho, 2, Wo, 2)
    xq = jnp.transpose(xq, (0, 3, 5, 1, 2, 4)).reshape(N, 4, Cin, HW)
    if Npad > N:
        xq = jnp.pad(xq, ((0, Npad - N), (0, 0), (0, 0), (0, 0)))

    # ---- VMEM budget / explicit limit (double-buffered blocks + weights) ----
    x_blk = n_blk * 4 * Cin * hw_t * stage_item
    o_blk = n_blk * Cout * hw_t * 4
    w_bytes = Cout * Cin * conv_item
    acc_bytes = 2 * Cin * hw_t * 4
    est = 2 * (x_blk + o_blk + w_bytes) + 2 * acc_bytes + 4 * Cin * 4
    vmem_limit = int(min(48 * _MIB, max(32 * _MIB, 2 * est)))

    # ---- pass 1: per-channel sum / sum-of-squares ---------------------------
    part_sum, part_sq = pl.pallas_call(
        functools.partial(bn_stats_kernel, n_blk=n_blk,
                          t_per_core=t_per_core, num_n=num_n),
        out_shape=(jax.ShapeDtypeStruct((2, Cin, hw_t), jnp.float32),
                   jax.ShapeDtypeStruct((2, Cin, hw_t), jnp.float32)),
        grid=(2, t_per_core, num_hw),
        in_specs=[pl.BlockSpec(
            (n_blk, 4, Cin, hw_t),
            lambda c, t, h: (jnp.minimum(c * t_per_core + t, num_n - 1), 0, 0, h))],
        out_specs=(pl.BlockSpec((None, Cin, hw_t), lambda c, t, h: (c, 0, 0)),
                   pl.BlockSpec((None, Cin, hw_t), lambda c, t, h: (c, 0, 0))),
        compiler_params=pltpu.CompilerParams(
            dimension_semantics=("parallel", "arbitrary", "arbitrary"),
            vmem_limit_bytes=vmem_limit),
    )(xq)

    # Fold BN into one per-channel scale/bias.  Zero-padded images add nothing
    # to the sums; divide by the true element count.
    count = jnp.float32(N * H * W)
    ch_sum = jnp.sum(part_sum, axis=(0, 2))
    ch_sq = jnp.sum(part_sq, axis=(0, 2))
    mean = ch_sum / count
    # NOTE: E[x^2]-E[x]^2 in f32 can cancel when |mean| >> std; accepted + clamped.
    var = jnp.maximum(ch_sq / count - mean * mean, 0.0)      # biased variance
    scale = gamma.astype(jnp.float32) * jax.lax.rsqrt(var + BN_EPS)
    bias = beta.astype(jnp.float32) - mean * scale
    scale2d = scale.reshape(Cin, 1)
    bias2d = bias.reshape(Cin, 1)
    # Fold the 2x2 average-pool factor into the conv weights (pool/conv commute).
    w_eff = (conv_w.reshape(Cout, Cin).astype(jnp.float32) * 0.25).astype(conv_in_dtype)

    # ---- pass 2: scale/bias -> ReLU -> pool (3 adds) -> 1x1 conv (MXU) ------
    out_pad = pl.pallas_call(
        functools.partial(transition_main_kernel, n_blk=n_blk,
                          conv_in_dtype=conv_in_dtype),
        out_shape=jax.ShapeDtypeStruct((Npad, Cout, HW), jnp.float32),
        grid=(num_n, num_hw),
        in_specs=[
            pl.BlockSpec((n_blk, 4, Cin, hw_t), lambda n, h: (n, 0, 0, h)),
            pl.BlockSpec((Cin, 1), lambda n, h: (0, 0)),
            pl.BlockSpec((Cin, 1), lambda n, h: (0, 0)),
            pl.BlockSpec((Cout, Cin), lambda n, h: (0, 0)),
        ],
        out_specs=pl.BlockSpec((n_blk, Cout, hw_t), lambda n, h: (n, 0, h)),
        compiler_params=pltpu.CompilerParams(
            dimension_semantics=("parallel", "parallel"),
            vmem_limit_bytes=vmem_limit),
    )(xq, scale2d, bias2d, w_eff)

    # Output is already channel-major per image: free reshape to NCHW, no transpose.
    return out_pad[:N].reshape(N, Cout, Ho, Wo)


def transition_reference(x_nchw, gamma, beta, conv_w):
    """Pure-JAX reference matching the PyTorch module semantics."""
    mean = jnp.mean(x_nchw, axis=(0, 2, 3), keepdims=True)
    var = jnp.mean((x_nchw - mean) ** 2, axis=(0, 2, 3), keepdims=True)
    xn = (x_nchw - mean) * jax.lax.rsqrt(var + BN_EPS)
    xn = xn * gamma.reshape(1, -1, 1, 1) + beta.reshape(1, -1, 1, 1)
    y = jnp.maximum(xn, 0.0)
    y = jnp.einsum('nchw,oc->nohw', y,
                   conv_w.reshape(conv_w.shape[0], conv_w.shape[1]))
    N, Co, H, W = y.shape
    y = y.reshape(N, Co, H // 2, 2, W // 2, 2).mean(axis=(3, 5))
    return y


if __name__ == "__main__":
    key = jax.random.PRNGKey(0)
    k_x, k_g, k_b, k_w = jax.random.split(key, 4)

    N, Cin, H, W = 2, 4, 16, 16
    Cout = 8

    x = jax.random.normal(k_x, (N, Cin, H, W), jnp.float32)
    gamma = jax.random.normal(k_g, (Cin,), jnp.float32) * 0.1 + 1.0
    beta = jax.random.normal(k_b, (Cin,), jnp.float32) * 0.1
    conv_w = jax.random.normal(k_w, (Cout, Cin, 1, 1), jnp.float32) * (2.0 / Cin) ** 0.5

    ref = transition_reference(x, gamma, beta, conv_w)

    # Default fast path: bf16 MXU inputs, f32 accumulation.
    out_bf16 = jax.block_until_ready(transition_forward(x, gamma, beta, conv_w))
    assert out_bf16.shape == (N, Cout, H // 2, W // 2), out_bf16.shape
    np.testing.assert_allclose(np.asarray(out_bf16), np.asarray(ref),
                               rtol=5e-2, atol=5e-2)

    # Full-precision path (tight check).
    out_f32 = jax.block_until_ready(
        transition_forward(x, gamma, beta, conv_w, conv_in_dtype=jnp.float32))
    np.testing.assert_allclose(np.asarray(out_f32), np.asarray(ref),
                               rtol=1e-4, atol=1e-5)

    print("KERNEL_OK")
</pallas_src>

<mosaic_0001>
module attributes {stable_mosaic.version = 11 : i64} {
  func.func @bn_stats_kernel(%arg0: i32, %arg1: i32, %arg2: i32, %arg3: memref<2x4x4x64xf32, #tpu.memory_space<vmem>>, %arg4: memref<1x4x64xf32, #tpu.memory_space<vmem>>, %arg5: memref<1x4x64xf32, #tpu.memory_space<vmem>>) attributes {dimension_semantics = [#tpu.dimension_semantics<parallel>, #tpu.dimension_semantics<arbitrary>, #tpu.dimension_semantics<arbitrary>], iteration_bounds = array<i64: 2, 1, 1>, scalar_prefetch = 0 : i64, scratch_operands = 0 : i64, tpu.core_type = #tpu.core_type<tc>, window_params = [{transform_indices = @transform_0, window_bounds = array<i64: 2, 4, 4, 64>}, {transform_indices = @transform_1, window_bounds = array<i64: 1, 4, 64>}, {transform_indices = @transform_2, window_bounds = array<i64: 1, 4, 64>}]} {
    %c0_i32 = arith.constant 0 : i32
    %0 = arith.cmpi eq, %arg1, %c0_i32 : i32
    %c0_i32_0 = arith.constant 0 : i32
    %1 = arith.cmpi eq, %arg2, %c0_i32_0 : i32
    %2 = arith.andi %0, %1 : i1
    %3 = arith.extui %2 : i1 to i32
    %c0_i32_1 = arith.constant 0 : i32
    %4 = arith.cmpi ne, %3, %c0_i32_1 : i32
    scf.if %4 {
      %cst = arith.constant 0.000000e+00 : f32
      %10 = vector.broadcast %cst : f32 to vector<4x64xf32>
      %c0 = arith.constant 0 : index
      %c0_4 = arith.constant 0 : index
      %c0_5 = arith.constant 0 : index
      %11 = vector.load %arg4[%c0, %c0_4, %c0_5] : memref<1x4x64xf32, #tpu.memory_space<vmem>>, vector<1x4x64xf32>
      %12 = vector.shape_cast %11 : vector<1x4x64xf32> to vector<4x64xf32>
      %13 = vector.shape_cast %10 : vector<4x64xf32> to vector<1x4x64xf32>
      tpu.vector_store %arg4[%c0, %c0_4, %c0_5], %13 {strides = array<i32>} : memref<1x4x64xf32, #tpu.memory_space<vmem>>, vector<1x4x64xf32>,
      %cst_6 = arith.constant 0.000000e+00 : f32
      %14 = vector.broadcast %cst_6 : f32 to vector<4x64xf32>
      %c0_7 = arith.constant 0 : index
      %c0_8 = arith.constant 0 : index
      %c0_9 = arith.constant 0 : index
      %15 = vector.load %arg5[%c0_7, %c0_8, %c0_9] : memref<1x4x64xf32, #tpu.memory_space<vmem>>, vector<1x4x64xf32>
      %16 = vector.shape_cast %15 : vector<1x4x64xf32> to vector<4x64xf32>
      %17 = vector.shape_cast %14 : vector<4x64xf32> to vector<1x4x64xf32>
      tpu.vector_store %arg5[%c0_7, %c0_8, %c0_9], %17 {strides = array<i32>} : memref<1x4x64xf32, #tpu.memory_space<vmem>>, vector<1x4x64xf32>,
    } else {
    }
    %c1_i32 = arith.constant 1 : i32
    %5 = arith.muli %arg0, %c1_i32 : i32
    %6 = arith.addi %5, %arg1 : i32
    %c1_i32_2 = arith.constant 1 : i32
    %7 = arith.cmpi slt, %6, %c1_i32_2 : i32
    %8 = arith.extui %7 : i1 to i32
    %c0_i32_3 = arith.constant 0 : i32
    %9 = arith.cmpi ne, %8, %c0_i32_3 : i32
    scf.if %9 {
      %c0 = arith.constant 0 : index
      %c0_4 = arith.constant 0 : index
      %c0_5 = arith.constant 0 : index
      %c0_6 = arith.constant 0 : index
      %10 = vector.load %arg3[%c0, %c0_4, %c0_5, %c0_6] : memref<2x4x4x64xf32, #tpu.memory_space<vmem>>, vector<1x1x4x64xf32>
      %11 = vector.shape_cast %10 : vector<1x1x4x64xf32> to vector<4x64xf32>
      %12 = arith.mulf %11, %11 : vector<4x64xf32>
      %c0_7 = arith.constant 0 : index
      %c1 = arith.constant 1 : index
      %c0_8 = arith.constant 0 : index
      %c0_9 = arith.constant 0 : index
      %13 = vector.load %arg3[%c0_7, %c1, %c0_8, %c0_9] : memref<2x4x4x64xf32, #tpu.memory_space<vmem>>, vector<1x1x4x64xf32>
      %14 = vector.shape_cast %13 : vector<1x1x4x64xf32> to vector<4x64xf32>
      %15 = arith.addf %11, %14 : vector<4x64xf32>
      %16 = arith.mulf %14, %14 : vector<4x64xf32>
      %17 = arith.addf %12, %16 : vector<4x64xf32>
      %c0_10 = arith.constant 0 : index
      %c2 = arith.constant 2 : index
      %c0_11 = arith.constant 0 : index
      %c0_12 = arith.constant 0 : index
      %18 = vector.load %arg3[%c0_10, %c2, %c0_11, %c0_12] : memref<2x4x4x64xf32, #tpu.memory_space<vmem>>, vector<1x1x4x64xf32>
      %19 = vector.shape_cast %18 : vector<1x1x4x64xf32> to vector<4x64xf32>
      %20 = arith.addf %15, %19 : vector<4x64xf32>
      %21 = arith.mulf %19, %19 : vector<4x64xf32>
      %22 = arith.addf %17, %21 : vector<4x64xf32>
      %c0_13 = arith.constant 0 : index
      %c3 = arith.constant 3 : index
      %c0_14 = arith.constant 0 : index
      %c0_15 = arith.constant 0 : index
      %23 = vector.load %arg3[%c0_13, %c3, %c0_14, %c0_15] : memref<2x4x4x64xf32, #tpu.memory_space<vmem>>, vector<1x1x4x64xf32>
      %24 = vector.shape_cast %23 : vector<1x1x4x64xf32> to vector<4x64xf32>
      %25 = arith.addf %20, %24 : vector<4x64xf32>
      %26 = arith.mulf %24, %24 : vector<4x64xf32>
      %27 = arith.addf %22, %26 : vector<4x64xf32>
      %c1_16 = arith.constant 1 : index
      %c0_17 = arith.constant 0 : index
      %c0_18 = arith.constant 0 : index
      %c0_19 = arith.constant 0 : index
      %28 = vector.load %arg3[%c1_16, %c0_17, %c0_18, %c0_19] : memref<2x4x4x64xf32, #tpu.memory_space<vmem>>, vector<1x1x4x64xf32>
      %29 = vector.shape_cast %28 : vector<1x1x4x64xf32> to vector<4x64xf32>
      %30 = arith.addf %25, %29 : vector<4x64xf32>
      %31 = arith.mulf %29, %29 : vector<4x64xf32>
      %32 = arith.addf %27, %31 : vector<4x64xf32>
      %c1_20 = arith.constant 1 : index
      %c1_21 = arith.constant 1 : index
      %c0_22 = arith.constant 0 : index
      %c0_23 = arith.constant 0 : index
      %33 = vector.load %arg3[%c1_20, %c1_21, %c0_22, %c0_23] : memref<2x4x4x64xf32, #tpu.memory_space<vmem>>, vector<1x1x4x64xf32>
      %34 = vector.shape_cast %33 : vector<1x1x4x64xf32> to vector<4x64xf32>
      %35 = arith.addf %30, %34 : vector<4x64xf32>
      %36 = arith.mulf %34, %34 : vector<4x64xf32>
      %37 = arith.addf %32, %36 : vector<4x64xf32>
      %c1_24 = arith.constant 1 : index
      %c2_25 = arith.constant 2 : index
      %c0_26 = arith.constant 0 : index
      %c0_27 = arith.constant 0 : index
      %38 = vector.load %arg3[%c1_24, %c2_25, %c0_26, %c0_27] : memref<2x4x4x64xf32, #tpu.memory_space<vmem>>, vector<1x1x4x64xf32>
      %39 = vector.shape_cast %38 : vector<1x1x4x64xf32> to vector<4x64xf32>
      %40 = arith.addf %35, %39 : vector<4x64xf32>
      %41 = arith.mulf %39, %39 : vector<4x64xf32>
      %42 = arith.addf %37, %41 : vector<4x64xf32>
      %c1_28 = arith.constant 1 : index
      %c3_29 = arith.constant 3 : index
      %c0_30 = arith.constant 0 : index
      %c0_31 = arith.constant 0 : index
      %43 = vector.load %arg3[%c1_28, %c3_29, %c0_30, %c0_31] : memref<2x4x4x64xf32, #tpu.memory_space<vmem>>, vector<1x1x4x64xf32>
      %44 = vector.shape_cast %43 : vector<1x1x4x64xf32> to vector<4x64xf32>
      %45 = arith.addf %40, %44 : vector<4x64xf32>
      %46 = arith.mulf %44, %44 : vector<4x64xf32>
      %47 = arith.addf %42, %46 : vector<4x64xf32>
      %c0_32 = arith.constant 0 : index
      %c0_33 = arith.constant 0 : index
      %c0_34 = arith.constant 0 : index
      %48 = vector.load %arg4[%c0_32, %c0_33, %c0_34] : memref<1x4x64xf32, #tpu.memory_space<vmem>>, vector<1x4x64xf32>
      %49 = vector.shape_cast %48 : vector<1x4x64xf32> to vector<4x64xf32>
      %50 = arith.addf %49, %45 : vector<4x64xf32>
      %c0_35 = arith.constant 0 : index
      %c0_36 = arith.constant 0 : index
      %c0_37 = arith.constant 0 : index
      %51 = vector.load %arg4[%c0_35, %c0_36, %c0_37] : memref<1x4x64xf32, #tpu.memory_space<vmem>>, vector<1x4x64xf32>
      %52 = vector.shape_cast %51 : vector<1x4x64xf32> to vector<4x64xf32>
      %53 = vector.shape_cast %50 : vector<4x64xf32> to vector<1x4x64xf32>
      tpu.vector_store %arg4[%c0_35, %c0_36, %c0_37], %53 {strides = array<i32>} : memref<1x4x64xf32, #tpu.memory_space<vmem>>, vector<1x4x64xf32>,
      %c0_38 = arith.constant 0 : index
      %c0_39 = arith.constant 0 : index
      %c0_40 = arith.constant 0 : index
      %54 = vector.load %arg5[%c0_38, %c0_39, %c0_40] : memref<1x4x64xf32, #tpu.memory_space<vmem>>, vector<1x4x64xf32>
      %55 = vector.shape_cast %54 : vector<1x4x64xf32> to vector<4x64xf32>
      %56 = arith.addf %55, %47 : vector<4x64xf32>
      %c0_41 = arith.constant 0 : index
      %c0_42 = arith.constant 0 : index
      %c0_43 = arith.constant 0 : index
      %57 = vector.load %arg5[%c0_41, %c0_42, %c0_43] : memref<1x4x64xf32, #tpu.memory_space<vmem>>, vector<1x4x64xf32>
      %58 = vector.shape_cast %57 : vector<1x4x64xf32> to vector<4x64xf32>
      %59 = vector.shape_cast %56 : vector<4x64xf32> to vector<1x4x64xf32>
      tpu.vector_store %arg5[%c0_41, %c0_42, %c0_43], %59 {strides = array<i32>} : memref<1x4x64xf32, #tpu.memory_space<vmem>>, vector<1x4x64xf32>,
    } else {
    }
    return
  }
  func.func @transform_0(%arg0: i32, %arg1: i32, %arg2: i32) -> (i32, i32, i32, i32) {
    %c1_i32 = arith.constant 1 : i32
    %0 = arith.muli %arg0, %c1_i32 : i32
    %1 = arith.addi %0, %arg1 : i32
    %c0_i32 = arith.constant 0 : i32
    %2 = arith.minsi %1, %c0_i32 : i32
    %c0_i32_0 = arith.constant 0 : i32
    %c0_i32_1 = arith.constant 0 : i32
    %c0_i32_2 = arith.constant 0 : i32
    return %2, %c0_i32_0, %c0_i32_1, %arg2 : i32, i32, i32, i32
  }
  func.func @transform_1(%arg0: i32, %arg1: i32, %arg2: i32) -> (i32, i32, i32) {
    %c0_i32 = arith.constant 0 : i32
    %c0_i32_0 = arith.constant 0 : i32
    %c0_i32_1 = arith.constant 0 : i32
    return %arg0, %c0_i32, %c0_i32_0 : i32, i32, i32
  }
  func.func @transform_2(%arg0: i32, %arg1: i32, %arg2: i32) -> (i32, i32, i32) {
    %c0_i32 = arith.constant 0 : i32
    %c0_i32_0 = arith.constant 0 : i32
    %c0_i32_1 = arith.constant 0 : i32
    return %arg0, %c0_i32, %c0_i32_0 : i32, i32, i32
  }
}

module attributes {stable_mosaic.version = 11 : i64} {
  func.func @transition_main_kernel(%arg0: i32, %arg1: i32, %arg2: memref<2x4x4x64xf32, #tpu.memory_space<vmem>>, %arg3: memref<4x1xf32, #tpu.memory_space<vmem>>, %arg4: memref<4x1xf32, #tpu.memory_space<vmem>>, %arg5: memref<8x4xbf16, #tpu.memory_space<vmem>>, %arg6: memref<2x8x64xf32, #tpu.memory_space<vmem>>) attributes {dimension_semantics = [#tpu.dimension_semantics<parallel>, #tpu.dimension_semantics<parallel>], iteration_bounds = array<i64: 1, 1>, scalar_prefetch = 0 : i64, scratch_operands = 0 : i64, tpu.core_type = #tpu.core_type<tc>, window_params = [{transform_indices = @transform_0, window_bounds = array<i64: 2, 4, 4, 64>}, {pipeline_mode = #tpu.pipeline_mode<synchronous>, transform_indices = @transform_1, window_bounds = array<i64: 4, 1>}, {pipeline_mode = #tpu.pipeline_mode<synchronous>, transform_indices = @transform_2, window_bounds = array<i64: 4, 1>}, {pipeline_mode = #tpu.pipeline_mode<synchronous>, transform_indices = @transform_3, window_bounds = array<i64: 8, 4>}, {transform_indices = @transform_4, window_bounds = array<i64: 2, 8, 64>}]} {
    %c0 = arith.constant 0 : index
    %c0_0 = arith.constant 0 : index
    %0 = vector.load %arg3[%c0, %c0_0] : memref<4x1xf32, #tpu.memory_space<vmem>>, vector<4x1xf32>
    %c0_1 = arith.constant 0 : index
    %c0_2 = arith.constant 0 : index
    %1 = vector.load %arg4[%c0_1, %c0_2] : memref<4x1xf32, #tpu.memory_space<vmem>>, vector<4x1xf32>
    %c0_3 = arith.constant 0 : index
    %c0_4 = arith.constant 0 : index
    %2 = vector.load %arg5[%c0_3, %c0_4] : memref<8x4xbf16, #tpu.memory_space<vmem>>, vector<8x4xbf16>
    %c0_5 = arith.constant 0 : index
    %c0_6 = arith.constant 0 : index
    %c0_7 = arith.constant 0 : index
    %c0_8 = arith.constant 0 : index
    %3 = vector.load %arg2[%c0_5, %c0_6, %c0_7, %c0_8] : memref<2x4x4x64xf32, #tpu.memory_space<vmem>>, vector<1x1x4x64xf32>
    %4 = vector.shape_cast %3 : vector<1x1x4x64xf32> to vector<4x64xf32>
    %5 = vector.broadcast %0 : vector<4x1xf32> to vector<4x64xf32>
    %6 = arith.mulf %4, %5 : vector<4x64xf32>
    %7 = vector.broadcast %1 : vector<4x1xf32> to vector<4x64xf32>
    %8 = arith.addf %6, %7 : vector<4x64xf32>
    %cst = arith.constant 0.000000e+00 : f32
    %9 = vector.broadcast %cst : f32 to vector<4x64xf32>
    %10 = arith.maximumf %8, %9 : vector<4x64xf32>
    %c0_9 = arith.constant 0 : index
    %c1 = arith.constant 1 : index
    %c0_10 = arith.constant 0 : index
    %c0_11 = arith.constant 0 : index
    %11 = vector.load %arg2[%c0_9, %c1, %c0_10, %c0_11] : memref<2x4x4x64xf32, #tpu.memory_space<vmem>>, vector<1x1x4x64xf32>
    %12 = vector.shape_cast %11 : vector<1x1x4x64xf32> to vector<4x64xf32>
    %13 = vector.broadcast %0 : vector<4x1xf32> to vector<4x64xf32>
    %14 = arith.mulf %12, %13 : vector<4x64xf32>
    %15 = vector.broadcast %1 : vector<4x1xf32> to vector<4x64xf32>
    %16 = arith.addf %14, %15 : vector<4x64xf32>
    %cst_12 = arith.constant 0.000000e+00 : f32
    %17 = vector.broadcast %cst_12 : f32 to vector<4x64xf32>
    %18 = arith.maximumf %16, %17 : vector<4x64xf32>
    %19 = arith.addf %10, %18 : vector<4x64xf32>
    %c0_13 = arith.constant 0 : index
    %c2 = arith.constant 2 : index
    %c0_14 = arith.constant 0 : index
    %c0_15 = arith.constant 0 : index
    %20 = vector.load %arg2[%c0_13, %c2, %c0_14, %c0_15] : memref<2x4x4x64xf32, #tpu.memory_space<vmem>>, vector<1x1x4x64xf32>
    %21 = vector.shape_cast %20 : vector<1x1x4x64xf32> to vector<4x64xf32>
    %22 = vector.broadcast %0 : vector<4x1xf32> to vector<4x64xf32>
    %23 = arith.mulf %21, %22 : vector<4x64xf32>
    %24 = vector.broadcast %1 : vector<4x1xf32> to vector<4x64xf32>
    %25 = arith.addf %23, %24 : vector<4x64xf32>
    %cst_16 = arith.constant 0.000000e+00 : f32
    %26 = vector.broadcast %cst_16 : f32 to vector<4x64xf32>
    %27 = arith.maximumf %25, %26 : vector<4x64xf32>
    %28 = arith.addf %19, %27 : vector<4x64xf32>
    %c0_17 = arith.constant 0 : index
    %c3 = arith.constant 3 : index
    %c0_18 = arith.constant 0 : index
    %c0_19 = arith.constant 0 : index
    %29 = vector.load %arg2[%c0_17, %c3, %c0_18, %c0_19] : memref<2x4x4x64xf32, #tpu.memory_space<vmem>>, vector<1x1x4x64xf32>
    %30 = vector.shape_cast %29 : vector<1x1x4x64xf32> to vector<4x64xf32>
    %31 = vector.broadcast %0 : vector<4x1xf32> to vector<4x64xf32>
    %32 = arith.mulf %30, %31 : vector<4x64xf32>
    %33 = vector.broadcast %1 : vector<4x1xf32> to vector<4x64xf32>
    %34 = arith.addf %32, %33 : vector<4x64xf32>
    %cst_20 = arith.constant 0.000000e+00 : f32
    %35 = vector.broadcast %cst_20 : f32 to vector<4x64xf32>
    %36 = arith.maximumf %34, %35 : vector<4x64xf32>
    %37 = arith.addf %28, %36 : vector<4x64xf32>
    %38 = arith.truncf %37 : vector<4x64xf32> to vector<4x64xbf16>
    %cst_21 = arith.constant dense<0.000000e+00> : vector<8x64xf32>
    %39 = tpu.matmul %2, %38, %cst_21 {dimension_numbers = #tpu.dot_dimension_numbers<[1], [0], [0], [1], [0, 0, 1, 1], [], []>} : vector<8x4xbf16>, vector<4x64xbf16>, vector<8x64xf32> -> vector<8x64xf32>
    %c0_22 = arith.constant 0 : index
    %c0_23 = arith.constant 0 : index
    %c0_24 = arith.constant 0 : index
    %40 = vector.load %arg6[%c0_22, %c0_23, %c0_24] : memref<2x8x64xf32, #tpu.memory_space<vmem>>, vector<1x8x64xf32>
    %41 = vector.shape_cast %40 : vector<1x8x64xf32> to vector<8x64xf32>
    %42 = vector.shape_cast %39 : vector<8x64xf32> to vector<1x8x64xf32>
    tpu.vector_store %arg6[%c0_22, %c0_23, %c0_24], %42 {strides = array<i32>} : memref<2x8x64xf32, #tpu.memory_space<vmem>>, vector<1x8x64xf32>,
    %c1_25 = arith.constant 1 : index
    %c0_26 = arith.constant 0 : index
    %c0_27 = arith.constant 0 : index
    %c0_28 = arith.constant 0 : index
    %43 = vector.load %arg2[%c1_25, %c0_26, %c0_27, %c0_28] : memref<2x4x4x64xf32, #tpu.memory_space<vmem>>, vector<1x1x4x64xf32>
    %44 = vector.shape_cast %43 : vector<1x1x4x64xf32> to vector<4x64xf32>
    %45 = vector.broadcast %0 : vector<4x1xf32> to vector<4x64xf32>
    %46 = arith.mulf %44, %45 : vector<4x64xf32>
    %47 = vector.broadcast %1 : vector<4x1xf32> to vector<4x64xf32>
    %48 = arith.addf %46, %47 : vector<4x64xf32>
    %cst_29 = arith.constant 0.000000e+00 : f32
    %49 = vector.broadcast %cst_29 : f32 to vector<4x64xf32>
    %50 = arith.maximumf %48, %49 : vector<4x64xf32>
    %c1_30 = arith.constant 1 : index
    %c1_31 = arith.constant 1 : index
    %c0_32 = arith.constant 0 : index
    %c0_33 = arith.constant 0 : index
    %51 = vector.load %arg2[%c1_30, %c1_31, %c0_32, %c0_33] : memref<2x4x4x64xf32, #tpu.memory_space<vmem>>, vector<1x1x4x64xf32>
    %52 = vector.shape_cast %51 : vector<1x1x4x64xf32> to vector<4x64xf32>
    %53 = vector.broadcast %0 : vector<4x1xf32> to vector<4x64xf32>
    %54 = arith.mulf %52, %53 : vector<4x64xf32>
    %55 = vector.broadcast %1 : vector<4x1xf32> to vector<4x64xf32>
    %56 = arith.addf %54, %55 : vector<4x64xf32>
    %cst_34 = arith.constant 0.000000e+00 : f32
    %57 = vector.broadcast %cst_34 : f32 to vector<4x64xf32>
    %58 = arith.maximumf %56, %57 : vector<4x64xf32>
    %59 = arith.addf %50, %58 : vector<4x64xf32>
    %c1_35 = arith.constant 1 : index
    %c2_36 = arith.constant 2 : index
    %c0_37 = arith.constant 0 : index
    %c0_38 = arith.constant 0 : index
    %60 = vector.load %arg2[%c1_35, %c2_36, %c0_37, %c0_38] : memref<2x4x4x64xf32, #tpu.memory_space<vmem>>, vector<1x1x4x64xf32>
    %61 = vector.shape_cast %60 : vector<1x1x4x64xf32> to vector<4x64xf32>
    %62 = vector.broadcast %0 : vector<4x1xf32> to vector<4x64xf32>
    %63 = arith.mulf %61, %62 : vector<4x64xf32>
    %64 = vector.broadcast %1 : vector<4x1xf32> to vector<4x64xf32>
    %65 = arith.addf %63, %64 : vector<4x64xf32>
    %cst_39 = arith.constant 0.000000e+00 : f32
    %66 = vector.broadcast %cst_39 : f32 to vector<4x64xf32>
    %67 = arith.maximumf %65, %66 : vector<4x64xf32>
    %68 = arith.addf %59, %67 : vector<4x64xf32>
    %c1_40 = arith.constant 1 : index
    %c3_41 = arith.constant 3 : index
    %c0_42 = arith.constant 0 : index
    %c0_43 = arith.constant 0 : index
    %69 = vector.load %arg2[%c1_40, %c3_41, %c0_42, %c0_43] : memref<2x4x4x64xf32, #tpu.memory_space<vmem>>, vector<1x1x4x64xf32>
    %70 = vector.shape_cast %69 : vector<1x1x4x64xf32> to vector<4x64xf32>
    %71 = vector.broadcast %0 : vector<4x1xf32> to vector<4x64xf32>
    %72 = arith.mulf %70, %71 : vector<4x64xf32>
    %73 = vector.broadcast %1 : vector<4x1xf32> to vector<4x64xf32>
    %74 = arith.addf %72, %73 : vector<4x64xf32>
    %cst_44 = arith.constant 0.000000e+00 : f32
    %75 = vector.broadcast %cst_44 : f32 to vector<4x64xf32>
    %76 = arith.maximumf %74, %75 : vector<4x64xf32>
    %77 = arith.addf %68, %76 : vector<4x64xf32>
    %78 = arith.truncf %77 : vector<4x64xf32> to vector<4x64xbf16>
    %cst_45 = arith.constant dense<0.000000e+00> : vector<8x64xf32>
    %79 = tpu.matmul %2, %78, %cst_45 {dimension_numbers = #tpu.dot_dimension_numbers<[1], [0], [0], [1], [0, 0, 1, 1], [], []>} : vector<8x4xbf16>, vector<4x64xbf16>, vector<8x64xf32> -> vector<8x64xf32>
    %c1_46 = arith.constant 1 : index
    %c0_47 = arith.constant 0 : index
    %c0_48 = arith.constant 0 : index
    %80 = vector.load %arg6[%c1_46, %c0_47, %c0_48] : memref<2x8x64xf32, #tpu.memory_space<vmem>>, vector<1x8x64xf32>
    %81 = vector.shape_cast %80 : vector<1x8x64xf32> to vector<8x64xf32>
    %82 = vector.shape_cast %79 : vector<8x64xf32> to vector<1x8x64xf32>
    tpu.vector_store %arg6[%c1_46, %c0_47, %c0_48], %82 {strides = array<i32>} : memref<2x8x64xf32, #tpu.memory_space<vmem>>, vector<1x8x64xf32>,
    return
  }
  func.func @transform_0(%arg0: i32, %arg1: i32) -> (i32, i32, i32, i32) {
    %c0_i32 = arith.constant 0 : i32
    %c0_i32_0 = arith.constant 0 : i32
    %c0_i32_1 = arith.constant 0 : i32
    return %arg0, %c0_i32, %c0_i32_0, %arg1 : i32, i32, i32, i32
  }
  func.func @transform_1(%arg0: i32, %arg1: i32) -> (i32, i32) {
    %c0_i32 = arith.constant 0 : i32
    %c0_i32_0 = arith.constant 0 : i32
    %c0_i32_1 = arith.constant 0 : i32
    return %c0_i32, %c0_i32_0 : i32, i32
  }
  func.func @transform_2(%arg0: i32, %arg1: i32) -> (i32, i32) {
    %c0_i32 = arith.constant 0 : i32
    %c0_i32_0 = arith.constant 0 : i32
    %c0_i32_1 = arith.constant 0 : i32
    return %c0_i32, %c0_i32_0 : i32, i32
  }
  func.func @transform_3(%arg0: i32, %arg1: i32) -> (i32, i32) {
    %c0_i32 = arith.constant 0 : i32
    %c0_i32_0 = arith.constant 0 : i32
    %c0_i32_1 = arith.constant 0 : i32
    return %c0_i32, %c0_i32_0 : i32, i32
  }
  func.func @transform_4(%arg0: i32, %arg1: i32) -> (i32, i32, i32) {
    %c0_i32 = arith.constant 0 : i32
    %c0_i32_0 = arith.constant 0 : i32
    return %arg0, %c0_i32, %arg1 : i32, i32, i32
  }
}

</mosaic_0001>

<bundles_post_ra>
// kernel: transition_forward.2
= control target key start
LH: loop header
LB: loop body
LE: loop exit
PB: predicated region body
PF: predicated region fallthrough
CT: control target
= control target key end

     0   :  { %s454_s9 = smov 0   ;;  %s456_s10 = smov 0   ;;  %s504_s0 = inlined_call_operand.vmem [shape: f32[2,4,4,64], index: 0, kind: input, shape index: {}]   ;;  %s505_s1 = inlined_call_operand.vmem [shape: f32[2,4,64], index: 1, kind: output, shape index: {0}]   ;;  %s506_s2 = inlined_call_operand.vmem [shape: f32[2,4,64], index: 2, kind: output, shape index: {1}]  }
   0x1   :  { %s458_s11 = smov 0  }
   0x2 LB: > { %s32_s12 = sadd.s32 1, %s432_s10  ;;  %p372_p0 = scmp.ge.s32.totalorder %s436_s11, 1  ;;  %s436_s11 = sphi %s458_s11, %s13_s11   ;;  %s432_s10 = sphi %s456_s10, %s508_s10   ;;  %s428_s9 = sphi %s454_s9, %s507_s9  }
   0x3   : > { %p34_p1 = scmp.ge.s32.totalorder %s32_s12, 2  ;;  %p153_p2 = scmp.lt.s32.totalorder %s436_s11, 3 }
   0x5   : > { %s510_s12 = smov (%p34_p1, %s32_s12), 0  ;;  %p154_p3 = pnand %p372_p0, %p153_p2 }
   0x6   : > { %p186_p4 = scmp.lt.s32.totalorder (!%p154_p3), %s428_s9, 0  ;;  %p201_p5 = scmp.lt.s32.totalorder (!%p154_p3), %s428_s9, 1  ;;  %vm215_vm0 = vcmask (!%p154_p3), 519168   ;;  %v438_v0 = vmov (!%p154_p3), 0.0  }
   0x7   : > { %157 = sbr.rel (%p154_p3) target bundleno = 42 (0x2a), region = 24  ;;  %p378_p7 = scmp.ge.s32.totalorder (!%p154_p3), %s428_s9, 1 }
   0xe   : > { %s187_s13 = scalar_select %p186_p4, %s428_s9, 0 }
   0xf   : > { %s202_s14 = scalar_select %p201_p5, %s428_s9, 1 }
  0x10   : > { %s373_s15 = sshll.u32 %s187_s13, 1  ;;  %222 = sbr.rel (%p378_p7) target bundleno = 42 (0x2a), region = 32 }
  0x11   : > { %p189_p6 = scmp.lt.s32.totalorder %s373_s15, 1  ;;  %s376_s16 = sshll.u32 %s202_s14, 2 }
  0x12   : > { %s475_s19 = scalar_lea.vmem %s505_s1, %s376_s16  ;;  %s480_s22 = scalar_lea.vmem %s506_s2, %s376_s16 }
  0x13   : > { %s512_s15 = smov (!%p189_p6, %s373_s15), 1  ;;  %216 = vst.msk [vmem:[%s475_s19] sm:$0xf] %vm215_vm0, %v438_v0  ;;  %217 = vst.msk [vmem:[%s480_s22] sm:$0xf] %vm215_vm0, %v438_v0 }
  0x14   : > { %s388_s23 = sshll.u32 %s512_s15, 4 }
  0x15   : > { %s196_s26 = scalar_lea.vmem %s504_s0, %s388_s23 }
  0x16   : > { %v223_v1 = vld [vmem:[%s196_s26] sm:$0xf] (!%p378_p7)  ;;  %v379_v2 = vld [vmem:[%s196_s26 + $0x4] sm:$0xf] (!%p378_p7)  ;;  %v380_v3 = vld [vmem:[%s196_s26 + $0x8] sm:$0xf] (!%p378_p7) }
  0x17   : > { %v227_v4 = vadd.f32 %v379_v2, %v223_v1  ;;  %v381_v5 = vld [vmem:[%s196_s26 + $0xc] sm:$0xf]  ;;  %v224_v6 = vmul.f32 %v223_v1, %v223_v1  ;;  %v228_v7 = vmul.f32 %v379_v2, %v379_v2  ;;  %v233_v8 = vmul.f32 %v380_v3, %v380_v3  ;;  %v382_v9 = vld [vmem:[%s196_s26 + $0x10] sm:$0xf]  ;;  %v383_v13 = vld [vmem:[%s196_s26 + $0x14] sm:$0xf] }
  0x18   : > { %v238_v12 = vmul.f32 %v381_v5, %v381_v5  ;;  %v243_v16 = vmul.f32 %v382_v9, %v382_v9  ;;  %v384_v17 = vld [vmem:[%s196_s26 + $0x18] sm:$0xf]  ;;  %v248_v20 = vmul.f32 %v383_v13, %v383_v13  ;;  %v385_v21 = vld [vmem:[%s196_s26 + $0x1c] sm:$0xf] }
  0x19   : > { %v232_v10 = vadd.f32 %v380_v3, %v227_v4  ;;  %v229_v11 = vadd.f32 %v228_v7, %v224_v6  ;;  %v253_v24 = vmul.f32 %v384_v17, %v384_v17  ;;  %v258_v27 = vmul.f32 %v385_v21, %v385_v21 }
  0x1a   : > { %v260_v28 = vld [vmem:[%s475_s19] sm:$0xf] }
  0x1b   : > { %v237_v14 = vadd.f32 %v381_v5, %v232_v10  ;;  %v234_v15 = vadd.f32 %v233_v8, %v229_v11  ;;  %v264_v31 = vld [vmem:[%s480_s22] sm:$0xf] }
  0x1d   : > { %v242_v18 = vadd.f32 %v382_v9, %v237_v14  ;;  %v239_v19 = vadd.f32 %v238_v12, %v234_v15 }
  0x1f   : > { %v247_v22 = vadd.f32 %v383_v13, %v242_v18  ;;  %v244_v23 = vadd.f32 %v243_v16, %v239_v19 }
  0x21   : > { %v252_v25 = vadd.f32 %v384_v17, %v247_v22  ;;  %v249_v26 = vadd.f32 %v248_v20, %v244_v23 }
  0x23   : > { %v257_v29 = vadd.f32 %v385_v21, %v252_v25  ;;  %v254_v30 = vadd.f32 %v253_v24, %v249_v26 }
  0x25   : > { %v261_v32 = vadd.f32 %v260_v28, %v257_v29  ;;  %v259_v33 = vadd.f32 %v258_v27, %v254_v30 }
  0x27   : > { %263 = vst.msk [vmem:[%s475_s19] sm:$0xf] %vm215_vm0, %v261_v32  ;;  %v265_v34 = vadd.f32 %v264_v31, %v259_v33 }
  0x29   : > { %266 = vst.msk [vmem:[%s480_s22] sm:$0xf] %vm215_vm0, %v265_v34 }
  0x2a PF: > { %s13_s11 = sadd.s32 1, %s436_s11   ;;  %s507_s9 = smov %s432_s10 }
  0x2b   : > { %p10_p8 = scmp.ge.s32.totalorder %s13_s11, 4   ;;  %s508_s10 = smov %s510_s12 }
  0x2d   :  { %12 = sbr.rel (!%p10_p8) target bundleno = 2 (0x2), region = 81 }

// kernel: transition_forward.3
= control target key start
LH: loop header
LB: loop body
LE: loop exit
PB: predicated region body
PF: predicated region fallthrough
CT: control target
= control target key end

     0   :  { %v207_v0 = vmov 0   ;;  %v208_v3 = vmov 0.0   ;;  %vm209_vm0 = vmmov 0   ;;  %vm58_vm1 = vcmask 1041408   ;;  %s274_s1 = inlined_call_operand.vmem [shape: f32[4,1], index: 1, kind: input, shape index: {}]   ;;  %s275_s2 = inlined_call_operand.vmem [shape: f32[4,1], index: 2, kind: input, shape index: {}]   ;;  %s276_s0 = inlined_call_operand.vmem [shape: f32[2,4,4,64], index: 0, kind: input, shape index: {}]   ;;  %s277_s3 = inlined_call_operand.vmem [shape: bf16[8,4], index: 3, kind: input, shape index: {}]   ;;  %s278_s4 = inlined_call_operand.vmem [shape: f32[2,8,64], index: 4, kind: output, shape index: {}]  }
   0x1   :  { %206 = vset.pattern.permute.xlu0 %v207_v0  ;;  %v18_v1 = vld [vmem:[%s274_s1] sm:$0xf]  ;;  %191 = vmatprep.subr.bf16.mxu0 %v208_v3  ;;  %v177_v6 = vld [vmem:[%s276_s0 + $0x4] sm:$0xf]  ;;  %v178_v7 = vld [vmem:[%s276_s0 + $0x8] sm:$0xf] }
   0x2   :  { %24 = vperm.xlu0 %206, %v18_v1   ;;  %v19_v2 = vld [vmem:[%s275_s2] sm:$0xf]  ;;  %197 = vmatprep.subr.bf16.mxu1 %v208_v3  ;;  %v181_v8 = vld [vmem:[%s276_s0 + $0x10] sm:$0xf]  ;;  %v182_v9 = vld [vmem:[%s276_s0 + $0x14] sm:$0xf] }
   0x3   :  { %193 = vmatprep.mubr.msk.bf16.mxu0 %vm209_vm0, %v208_v3  ;;  %199 = vmatprep.mubr.msk.bf16.mxu1 %vm209_vm0, %v208_v3  ;;  %v21_v5 = vld [vmem:[%s276_s0] sm:$0xf]  ;;  %v183_v10 = vld [vmem:[%s276_s0 + $0x18] sm:$0xf]  ;;  %v179_v11 = vld [vmem:[%s276_s0 + $0xc] sm:$0xf] }
   0x4   :  { %v184_v15 = vld [vmem:[%s276_s0 + $0x1c] sm:$0xf]  ;;  %v20_v48 = vld [vmem:[%s277_s3] sm:$0xf]  ;;  %vm54_vm2 = vcmask 31744   ;;  %vm102_vm3 = vcmask 523264  }
   0x6   :  { %30 = vperm.xlu0 %206, %v19_v2  }
  0x81   :  { %v25_v4 = vpop.permute.xlu0 %24 }
  0x82   :  { %v27_v12 = vmul.f32 %v25_v4, %v21_v5  ;;  %v37_v13 = vmul.f32 %v177_v6, %v25_v4  ;;  %v43_v14 = vmul.f32 %v178_v7, %v25_v4  ;;  %v106_v17 = vmul.f32 %v181_v8, %v25_v4 }
  0x83   :  { %v111_v18 = vmul.f32 %v182_v9, %v25_v4  ;;  %v117_v19 = vmul.f32 %v183_v10, %v25_v4  ;;  %v49_v23 = vmul.f32 %v179_v11, %v25_v4  ;;  %v123_v27 = vmul.f32 %v184_v15, %v25_v4 }
  0x85   :  { %v31_v16 = vpop.permute.xlu0 %30 }
  0x86   :  { %v33_v20 = vadd.f32 %v31_v16, %v27_v12  ;;  %v38_v21 = vadd.f32 %v37_v13, %v31_v16  ;;  %v44_v22 = vadd.f32 %v43_v14, %v31_v16  ;;  %v107_v24 = vadd.f32 %v106_v17, %v31_v16 }
  0x87   :  { %v112_v25 = vadd.f32 %v111_v18, %v31_v16  ;;  %v118_v26 = vadd.f32 %v117_v19, %v31_v16  ;;  %v50_v30 = vadd.f32 %v49_v23, %v31_v16  ;;  %v124_v33 = vadd.f32 %v123_v27, %v31_v16 }
  0x88   :  { %v34_v28 = vmax.f32 %v33_v20, 0.0  ;;  %v39_v29 = vmax.f32 %v38_v21, 0.0  ;;  %v108_v31 = vmax.f32 %v107_v24, 0.0  ;;  %v45_v35 = vmax.f32 %v44_v22, 0.0 }
  0x89   :  { %v113_v32 = vmax.f32 %v112_v25, 0.0  ;;  %v119_v37 = vmax.f32 %v118_v26, 0.0  ;;  %v51_v39 = vmax.f32 %v50_v30, 0.0  ;;  %v125_v41 = vmax.f32 %v124_v33, 0.0 }
  0x8a   :  { %v40_v34 = vadd.f32 %v39_v29, %v34_v28 }
  0x8b   :  { %v114_v36 = vadd.f32 %v113_v32, %v108_v31 }
  0x8c   :  { %v46_v38 = vadd.f32 %v45_v35, %v40_v34 }
  0x8d   :  { %v120_v40 = vadd.f32 %v119_v37, %v114_v36 }
  0x8e   :  { %v52_v42 = vadd.f32 %v51_v39, %v46_v38 }
  0x8f   :  { %v126_v43 = vadd.f32 %v125_v41, %v120_v40 }
  0x90   :  { %v53_v44 = vpack.c.bf16 %v52_v42, %v52_v42 }
  0x91   :  { %v127_v45 = vpack.c.bf16 %v126_v43, %v126_v43 }
  0x92   :  { %v60_v46 = vsel %vm58_vm1, %v53_v44, 0 }
  0x93   :  { %192 = vmatpush3.bf16.msra.mxu0 %v60_v46  ;;  %v129_v47 = vsel %vm58_vm1, %v127_v45, 0 }
  0x94   :  { %198 = vmatpush3.bf16.msra.mxu1 %v129_v47 }
  0x96   :  { %194 = vmatmul.mubr.msk.bf16.vlgmr.msra.gmra.mrb[0].mxu0 %vm54_vm2, %v20_v48 }
  0x97   :  { %200 = vmatmul.mubr.msk.bf16.vlgmr.msra.gmra.mrb[0].mxu1 %vm54_vm2, %v20_v48 }
 0x169   :  { %v96_v49 = vpop.f32.mrb[0].mxu0 }
 0x16a   :  { %103 = vst.msk [vmem:[%s278_s4] sm:$0xff] %vm102_vm3, %v96_v49  ;;  %v165_v50 = vpop.f32.mrb[0].mxu1  ;;  %v195_v51 = vpop.f32.mrb[1].mxu0 }
 0x16b   :  { %186 = vst.msk [vmem:[%s278_s4 + $0x8] sm:$0xff] %vm102_vm3, %v165_v50  ;;  %v201_v52 = vpop.f32.mrb[1].mxu1  ;;  %v99_v53 = vpop.f32.mrb[2].mxu0 }
 0x16c   :  { %v168_v54 = vpop.f32.mrb[2].mxu1  ;;  %v196_v55 = vpop.f32.mrb[3].mxu0 }
 0x16d   :  { %v202_v56 = vpop.f32.mrb[3].mxu1 }

</bundles_post_ra>
